<compile_context>
chip_gen: v6e
topology: v6e:2x2x1
jax: 0.10.0
libtpu: 0.0.40
codegen_flags: <defaults>
</compile_context>

<pallas_src>
import functools
import math

import jax
import jax.numpy as jnp
from jax.experimental import pallas as pl
from jax.experimental.pallas import tpu as pltpu

_LANES = 128
_SUBLANES = 8


def _ci_loss_kernel(pred_ref, target_ref, min_ref, max_ref, out_ref, *, eps):
    # Upcast so bf16 inputs also compute log/mul/accumulate in f32.
    pred = pred_ref[...].astype(jnp.float32)
    tgt = target_ref[...].astype(jnp.float32)
    mn = min_ref[...].astype(jnp.float32)
    mx = max_ref[...].astype(jnp.float32)

    # mask = target where pred lies inside [min, max], else pred
    inside = jnp.logical_and(pred <= mx, pred >= mn)
    mask = jnp.where(inside, tgt, pred)

    # elementwise cross-entropy (EUP log + VPU mul)
    loss = -tgt * jnp.log(mask + eps)

    # VPU-only partial reduction: fold the whole tile into one (8, 128) slab by
    # adding (8, 128) vregs together; the cross-lane reduce is deferred to the
    # wrapper so the per-step inner loop stays hidden under the DMA pipeline.
    rows = loss.shape[0]
    partial = loss.reshape(rows // _SUBLANES, _SUBLANES, _LANES).sum(axis=0)
    out_ref[...] = partial[None, :, :]


def confidential_interval_loss(pred, target, min_value, max_value, eps=1e-8):
    """Pallas TPU implementation of ConfidentialIntervalLoss.forward.

    pred, target, min_value, max_value: same-shaped arrays, classes along the
    last axis. Returns a scalar float32.
    """
    shape = pred.shape
    assert target.shape == shape
    assert min_value.shape == shape
    assert max_value.shape == shape

    # mean is taken over all leading (non-class) dims
    batch_total = math.prod(shape[:-1]) if len(shape) > 1 else 1
    n = math.prod(shape)

    # ---- lane-dense repack geometry -------------------------------------
    rows = pl.cdiv(n, _LANES)                       # 128-lane rows needed
    rows_rounded = pl.cdiv(rows, _SUBLANES) * _SUBLANES

    # ---- tile sizing from per-generation VMEM capacity -------------------
    try:
        vmem_cap = pltpu.get_tpu_info().vmem_capacity_bytes
    except Exception:
        vmem_cap = 64 << 20  # conservative fallback (v7x per-TC VMEM)
    budget = vmem_cap // 4                           # headroom for pipeline/output
    bytes_per_block_row = 4 * 2 * _LANES * 4         # 4 inputs x 2 buffers x f32 row
    block_rows = budget // bytes_per_block_row
    block_rows = max(_SUBLANES, min(block_rows, 4096))
    block_rows = (block_rows // _SUBLANES) * _SUBLANES
    block_rows = min(block_rows, rows_rounded)       # never bigger than the data

    num_tiles = pl.cdiv(rows, block_rows)
    rows_pad = num_tiles * block_rows
    n_pad = rows_pad * _LANES

    # Padded elements: target = 0 and pred = 1 inside [0, 2] -> mask = 0,
    # loss = -0 * log(eps) = 0, so padding contributes nothing to the sum.
    def _repack(x, pad_value):
        flat = x.reshape(-1)
        if n_pad > n:
            pad = jnp.full((n_pad - n,), pad_value, dtype=flat.dtype)
            flat = jnp.concatenate([flat, pad])
        return flat.reshape(rows_pad, _LANES)

    pred_p = _repack(pred, 1.0)
    tgt_p = _repack(target, 0.0)
    min_p = _repack(min_value, 0.0)
    max_p = _repack(max_value, 2.0)

    kernel = functools.partial(_ci_loss_kernel, eps=eps)
    in_spec = pl.BlockSpec((block_rows, _LANES), lambda i: (i, 0))

    partials = pl.pallas_call(
        kernel,
        out_shape=jax.ShapeDtypeStruct((num_tiles, _SUBLANES, _LANES),
                                       jnp.float32),
        grid_spec=pltpu.PrefetchScalarGridSpec(
            num_scalar_prefetch=0,
            grid=(num_tiles,),
            in_specs=[in_spec, in_spec, in_spec, in_spec],
            out_specs=pl.BlockSpec((1, _SUBLANES, _LANES),
                                   lambda i: (i, 0, 0)),
        ),
        compiler_params=pltpu.CompilerParams(
            dimension_semantics=("parallel",),        # no cross-step deps
            vmem_limit_bytes=int(min(vmem_cap // 2, 64 << 20)),
        ),
    )(pred_p, tgt_p, min_p, max_p)

    # Tiny final cross-lane reduce + mean; left to XLA in the wrapper.
    return jnp.sum(partials) / jnp.float32(batch_total)


def _reference(pred, target, min_value, max_value, eps=1e-8):
    mask = jnp.where((pred <= max_value) & (pred >= min_value), target, pred)
    loss = -target * jnp.log(mask + eps)
    return jnp.mean(jnp.sum(loss, axis=-1))


def _make_inputs(key, B, C):
    k1, k2, k3 = jax.random.split(key, 3)
    pred = jax.nn.softmax(jax.random.normal(k1, (B, C)), axis=-1)
    target = jax.nn.softmax(jax.random.normal(k2, (B, C)) * 2.0, axis=-1)
    width = 0.05 * jax.random.uniform(k3, (B, C)) + 0.01
    min_value = jnp.clip(target - width, 0.0, 1.0).astype(jnp.float32)
    max_value = jnp.clip(target + width, 0.0, 1.0).astype(jnp.float32)
    return (pred.astype(jnp.float32), target.astype(jnp.float32),
            min_value, max_value)


if __name__ == "__main__":
    key = jax.random.PRNGKey(0)

    # Primary case: bag-level predictions, C classes (lane-sparse C handled
    # by the lane-dense repack inside the wrapper).
    pred, target, min_value, max_value = _make_inputs(key, 16, 32)
    out = confidential_interval_loss(pred, target, min_value, max_value)
    out = jax.block_until_ready(out)
    ref = _reference(pred, target, min_value, max_value)
    assert jnp.allclose(out, ref, rtol=1e-5, atol=1e-6), (out, ref)

    # Non-aligned shapes exercise the padding path.
    pred2, target2, min2, max2 = _make_inputs(jax.random.PRNGKey(1), 7, 13)
    out2 = confidential_interval_loss(pred2, target2, min2, max2)
    out2 = jax.block_until_ready(out2)
    ref2 = _reference(pred2, target2, min2, max2)
    assert jnp.allclose(out2, ref2, rtol=1e-5, atol=1e-6), (out2, ref2)

    print("KERNEL_OK")
</pallas_src>

<mosaic_0001>
module attributes {stable_mosaic.version = 11 : i64} {
  func.func @_ci_loss_kernel(%arg0: i32, %arg1: memref<8x128xf32, #tpu.memory_space<vmem>>, %arg2: memref<8x128xf32, #tpu.memory_space<vmem>>, %arg3: memref<8x128xf32, #tpu.memory_space<vmem>>, %arg4: memref<8x128xf32, #tpu.memory_space<vmem>>, %arg5: memref<1x8x128xf32, #tpu.memory_space<vmem>>) attributes {dimension_semantics = [#tpu.dimension_semantics<parallel>], iteration_bounds = array<i64: 1>, scalar_prefetch = 0 : i64, scratch_operands = 0 : i64, tpu.core_type = #tpu.core_type<tc>, window_params = [{transform_indices = @transform_0, window_bounds = array<i64: 8, 128>}, {transform_indices = @transform_1, window_bounds = array<i64: 8, 128>}, {transform_indices = @transform_2, window_bounds = array<i64: 8, 128>}, {transform_indices = @transform_3, window_bounds = array<i64: 8, 128>}, {transform_indices = @transform_4, window_bounds = array<i64: 1, 8, 128>}]} {
    %c0 = arith.constant 0 : index
    %c0_0 = arith.constant 0 : index
    %0 = vector.load %arg1[%c0, %c0_0] : memref<8x128xf32, #tpu.memory_space<vmem>>, vector<8x128xf32>
    %c0_1 = arith.constant 0 : index
    %c0_2 = arith.constant 0 : index
    %1 = vector.load %arg2[%c0_1, %c0_2] : memref<8x128xf32, #tpu.memory_space<vmem>>, vector<8x128xf32>
    %c0_3 = arith.constant 0 : index
    %c0_4 = arith.constant 0 : index
    %2 = vector.load %arg3[%c0_3, %c0_4] : memref<8x128xf32, #tpu.memory_space<vmem>>, vector<8x128xf32>
    %c0_5 = arith.constant 0 : index
    %c0_6 = arith.constant 0 : index
    %3 = vector.load %arg4[%c0_5, %c0_6] : memref<8x128xf32, #tpu.memory_space<vmem>>, vector<8x128xf32>
    %4 = arith.cmpf ole, %0, %3 : vector<8x128xf32>
    %5 = arith.cmpf oge, %0, %2 : vector<8x128xf32>
    %6 = arith.andi %4, %5 : vector<8x128xi1>
    %7 = arith.select %6, %1, %0 : vector<8x128xi1>, vector<8x128xf32>
    %cst = arith.constant 0.000000e+00 : f32
    %8 = vector.broadcast %cst : f32 to vector<8x128xf32>
    %9 = arith.subf %8, %1 : vector<8x128xf32>
    %cst_7 = arith.constant 9.99999993E-9 : f32
    %10 = vector.broadcast %cst_7 : f32 to vector<8x128xf32>
    %11 = arith.addf %7, %10 : vector<8x128xf32>
    %12 = math.log %11 : vector<8x128xf32>
    %13 = arith.mulf %9, %12 : vector<8x128xf32>
    %14 = vector.shape_cast %13 : vector<8x128xf32> to vector<1x8x128xf32>
    %cst_8 = arith.constant dense<0.000000e+00> : vector<8x128xf32>
    %15 = vector.multi_reduction <add>, %14, %cst_8 [0] : vector<1x8x128xf32> to vector<8x128xf32>
    %16 = vector.shape_cast %15 : vector<8x128xf32> to vector<1x8x128xf32>
    %c0_9 = arith.constant 0 : index
    %c0_10 = arith.constant 0 : index
    %c0_11 = arith.constant 0 : index
    %17 = vector.load %arg5[%c0_9, %c0_10, %c0_11] : memref<1x8x128xf32, #tpu.memory_space<vmem>>, vector<1x8x128xf32>
    tpu.vector_store %arg5[%c0_9, %c0_10, %c0_11], %16 {strides = array<i32>} : memref<1x8x128xf32, #tpu.memory_space<vmem>>, vector<1x8x128xf32>,
    return
  }
  func.func @transform_0(%arg0: i32) -> (i32, i32) {
    %c0_i32 = arith.constant 0 : i32
    %c0_i32_0 = arith.constant 0 : i32
    return %arg0, %c0_i32 : i32, i32
  }
  func.func @transform_1(%arg0: i32) -> (i32, i32) {
    %c0_i32 = arith.constant 0 : i32
    %c0_i32_0 = arith.constant 0 : i32
    return %arg0, %c0_i32 : i32, i32
  }
  func.func @transform_2(%arg0: i32) -> (i32, i32) {
    %c0_i32 = arith.constant 0 : i32
    %c0_i32_0 = arith.constant 0 : i32
    return %arg0, %c0_i32 : i32, i32
  }
  func.func @transform_3(%arg0: i32) -> (i32, i32) {
    %c0_i32 = arith.constant 0 : i32
    %c0_i32_0 = arith.constant 0 : i32
    return %arg0, %c0_i32 : i32, i32
  }
  func.func @transform_4(%arg0: i32) -> (i32, i32, i32) {
    %c0_i32 = arith.constant 0 : i32
    %c0_i32_0 = arith.constant 0 : i32
    %c0_i32_1 = arith.constant 0 : i32
    return %arg0, %c0_i32, %c0_i32_0 : i32, i32, i32
  }
}

</mosaic_0001>

<bundles_post_ra>
// kernel: tpu_custom_call.1
= control target key start
LH: loop header
LB: loop body
LE: loop exit
PB: predicated region body
PF: predicated region fallthrough
CT: control target
= control target key end

     0   :  { %9 = vsyncpa [#allocation3], 0  ;;  %s257_s0 = inlined_call_operand.hbm [shape: f32[8,128], index: 0, kind: input, shape index: {}]   ;;  %s258_s1 = inlined_call_operand.hbm [shape: f32[8,128], index: 1, kind: input, shape index: {}]   ;;  %s259_s2 = inlined_call_operand.hbm [shape: f32[8,128], index: 2, kind: input, shape index: {}]   ;;  %s260_s3 = inlined_call_operand.hbm [shape: f32[8,128], index: 3, kind: input, shape index: {}]   ;;  %s261_s4 = inlined_call_operand.hbm [shape: f32[1,8,128], index: 4, kind: output, shape index: {}]  }
   0x1   :  { %10 = vsyncpa [#allocation6], 0 }
   0x2   :  { %11 = vsyncpa [#allocation9], 0 }
   0x3   :  { %12 = vsyncpa [#allocation4], 0  ;;  %s212_s15 = smov [#allocation5]   ;;  %s213_s17 = smov [#allocation2]  }
   0x4   :  { %s29_s16 = sshll.u32 %s212_s15, 4  ;;  %s19_s18 = sshll.u32 %s213_s17, 4  ;;  %s30_s16 = int_to_ptr.vmem [resolvable:$true] %s29_s16  ;;  %s20_s18 = int_to_ptr.vmem [resolvable:$true] %s19_s18 }
   0x5   :  { %s112_s19 = scalar_lea.vmem %s30_s16, 128  ;;  %p117_p1 = scmp.lt.s32.totalorder %s30_s16, %s30_s16 }
   0x6   :  { %p113_p0 = scmp.ne.s32.totalorder %s30_s16, %s112_s19  ;;  %p118_p2 = scmp.lt.s32.totalorder %s112_s19, %s112_s19 }
   0x8   :  { %p119_p3 = por %p118_p2, %p117_p1 }
   0xa   :  { %p120_p4 = pnand %p119_p3, %p113_p0 }
   0xc   :  { %123 = shalt.err (!%p120_p4)
}
   0xd   :  { %32 = dma.hbm_to_vmem [thread:$0]  %s258_s1, 128, %s30_s16, [#allocation6]  }
   0xe   :  { %s132_s22 = scalar_lea.vmem %s20_s18, 128  ;;  %p137_p6 = scmp.lt.s32.totalorder %s20_s18, %s20_s18 }
   0xf   :  { %p133_p5 = scmp.ne.s32.totalorder %s20_s18, %s132_s22  ;;  %p138_p7 = scmp.lt.s32.totalorder %s132_s22, %s132_s22 }
  0x11   :  { %p139_p8 = por %p138_p7, %p137_p6 }
  0x13   :  { %p140_p9 = pnand %p139_p8, %p133_p5 }
  0x15   :  { %143 = shalt.err (!%p140_p9)
}
  0x16   :  { %22 = dma.hbm_to_vmem [thread:$0]  %s257_s0, 128, %s20_s18, [#allocation3]  }
  0x17   :  { %s214_s25 = smov [#allocation7]   ;;  %s215_s27 = smov [#allocation8]  }
  0x18   :  { %s39_s26 = sshll.u32 %s214_s25, 4  ;;  %s49_s28 = sshll.u32 %s215_s27, 4  ;;  %s40_s26 = int_to_ptr.vmem [resolvable:$true] %s39_s26  ;;  %s50_s28 = int_to_ptr.vmem [resolvable:$true] %s49_s28 }
  0x19   :  { %s152_s29 = scalar_lea.vmem %s40_s26, 128  ;;  %p157_p11 = scmp.lt.s32.totalorder %s40_s26, %s40_s26 }
  0x1a   :  { %p153_p10 = scmp.ne.s32.totalorder %s40_s26, %s152_s29  ;;  %p158_p12 = scmp.lt.s32.totalorder %s152_s29, %s152_s29 }
  0x1c   :  { %p159_p13 = por %p158_p12, %p157_p11 }
  0x1e   :  { %p160_p0 = pnand %p159_p13, %p153_p10 }
  0x20   :  { %163 = shalt.err (!%p160_p0)
}
  0x21   :  { %42 = dma.hbm_to_vmem [thread:$0]  %s259_s2, 128, %s40_s26, [#allocation6]  }
  0x22   :  { %s172_s5 = scalar_lea.vmem %s50_s28, 128  ;;  %p177_p2 = scmp.lt.s32.totalorder %s50_s28, %s50_s28 }
  0x23   :  { %p173_p1 = scmp.ne.s32.totalorder %s50_s28, %s172_s5  ;;  %p178_p3 = scmp.lt.s32.totalorder %s172_s5, %s172_s5 }
  0x25   :  { %p179_p4 = por %p178_p3, %p177_p2 }
  0x27   :  { %p180_p5 = pnand %p179_p4, %p173_p1 }
  0x29   :  { %183 = shalt.err (!%p180_p5)
}
  0x2a   :  { %52 = dma.hbm_to_vmem [thread:$0]  %s260_s3, 128, %s50_s28, [#allocation9]  }
  0x2b   :  { %204 = dma.done.wait [#allocation3], 128  }
  0x2c   :  { %205 = vsyncadd [#allocation3], 4294967168 }
  0x2d   :  { %206 = dma.done.wait [#allocation6], 256  }
  0x2e   :  { %207 = vsyncadd [#allocation6], 4294967040 }
  0x2f   :  { %208 = dma.done.wait [#allocation9], 128  }
  0x30   :  { %209 = vsyncadd [#allocation9], 4294967168  ;;  %v65_v0 = vld [vmem:[#allocation2] sm:$0xff]  ;;  %v67_v1 = vld [vmem:[#allocation7] sm:$0xff]  ;;  %s216_s2 = smov [#allocation10]  }
  0x31   :  { %v66_v2 = vld [vmem:[#allocation5] sm:$0xff]  ;;  %v68_v3 = vld [vmem:[#allocation8] sm:$0xff]  ;;  %vm70_vm0 = vcmp.ge.f32.partialorder %v65_v0, %v67_v1  ;;  %s86_s3 = sshll.u32 %s216_s2, 4  ;;  %s87_s3 = int_to_ptr.vmem [resolvable:$true] %s86_s3 }
  0x32   :  { %vm69_vm1 = vcmp.le.f32.partialorder %v65_v0, %v68_v3  ;;  %v73_v6 = vsub.f32 0.0, %v66_v2  ;;  %s184_s7 = scalar_lea.vmem %s87_s3, 128  ;;  %p189_p7 = scmp.lt.s32.totalorder %s87_s3, %s87_s3 }
  0x33   :  { %vm71_vm2 = vmand %vm69_vm1, %vm70_vm0  ;;  %p185_p6 = scmp.ne.s32.totalorder %s87_s3, %s184_s7  ;;  %p190_p8 = scmp.lt.s32.totalorder %s184_s7, %s184_s7 }
  0x34   :  { %v72_v4 = vsel %vm71_vm2, %v66_v2, %v65_v0 }
  0x35   :  { %v74_v5 = vadd.f32 1e-08, %v72_v4  ;;  %p191_p9 = por %p190_p8, %p189_p7 }
  0x37   :  { %102 = vlog2.f32 %v74_v5  ;;  %p192_p10 = pnand %p191_p9, %p185_p6 }
  0x44   :  { %v103_v7 = vpop.eup %102 }
  0x45   :  { %v76_v8 = vmul.f32 0.6931472, %v103_v7 }
  0x47   :  { %v77_v9 = vmul.f32 %v76_v8, %v73_v6 }
  0x49   :  { %79 = vst [vmem:[#allocation10] sm:$0xff] %v77_v9 }
  0x4a   :  { %195 = shalt.err (!%p192_p10)
}
  0x4b   :  { %89 = dma.vmem_to_hbm [thread:$0]  %s87_s3, 128, %s261_s4, [#allocation4]  }
  0x4c   :  { %210 = dma.done.wait [#allocation4], 128  }
  0x4d   :  { %211 = vsyncadd [#allocation4], 4294967168 }
  0x4e   :  { %93 = vsyncpa [#allocation3], 1 }
  0x4f   :  { %94 = vsyncpa [#allocation6], 1 }
  0x50   :  { %95 = vsyncpa [#allocation9], 1 }
  0x51   :  { %96 = vsyncpa [#allocation4], 1 }

</bundles_post_ra>
